<compile_context>
chip_gen: v7x
topology: tpu7x:2x2x1
jax: 0.10.0
libtpu: 0.0.40
codegen_flags: <defaults>
</compile_context>

<pallas_src>
import jax
import jax.numpy as jnp
from jax.experimental import pallas as pl
from jax.experimental.pallas import tpu as pltpu


def gcn_ff_kernel(a_ref, w_ref, x_ref, o_ref):
    # a_ref: (TILE_R, G*N)       bf16  row tile of kron(I_G, A_sym_norm)
    # w_ref: (T*F_in, T*F_out)   bf16  kron(I_T, Theta^T)       (grid-invariant)
    # x_ref: (G*N, T*F_in)       bf16  one batch-group slab; rows = nodes, lanes = (t, f)
    # o_ref: (TILE_R, T*F_out)   f32   lane-dense output row tile
    #
    # 1) Node mixing over the adjacency (block-diag A keeps batches separate).
    #    bf16 MXU inputs, f32 accumulation; intermediate stays f32.
    y = jnp.dot(a_ref[...], x_ref[...], preferred_element_type=jnp.float32)
    # 2) Per-timestep feature transform via the block-diagonal weight
    #    (column block t of w_ref is Theta^T acting on time step t) -- no relayout needed.
    z = jnp.dot(y, w_ref[...], preferred_element_type=jnp.float32)
    # relu (gcn) + relu (FF wrapper) fused; dropout(p=0.0) is the identity.
    o_ref[...] = jnp.maximum(z, 0.0).astype(o_ref.dtype)


def _largest_batch_group(batch, n_nodes, row_cap=256):
    """Largest divisor G of batch with G*N <= row_cap (fuse G batches per grid step)."""
    g = 1
    for d in range(1, batch + 1):
        if batch % d == 0 and d * n_nodes <= row_cap:
            g = d
    return g


def _pick_row_tile(rows):
    """Row-tile size for the adjacency output rows."""
    if rows <= 256:
        return rows
    for t in (256, 128):
        if rows % t == 0:
            return t
    # TODO(synk): pad N up to a multiple of 128 for very large, ragged node counts.
    return rows


def position_wise_gcn_feed_forward(x, sym_norm_adj, theta_weight_t, dropout_p=0.0):
    """
    x:               (B, N, T, F_in)   float32
    sym_norm_adj:    (N, N)            float32
    theta_weight_t:  (F_in, F_out)     float32  (transpose of nn.Linear weight)
    returns:         (B, N, T, F_out)  float32
    """
    if dropout_p != 0.0:
        # TODO(synk): training-mode dropout (p > 0) not implemented; eval / p=0.0 only.
        raise NotImplementedError("dropout p > 0 (training mode) is not supported")

    B, N, T, F_in = x.shape
    F_out = theta_weight_t.shape[1]
    TFI, TFO = T * F_in, T * F_out

    # --- batch grouping: fuse G batches into one grid step via block-diag(A) ---
    G = _largest_batch_group(B, N)
    GN = G * N
    n_groups = B // G

    # --- row tiling of the (block-diag) adjacency output rows ---
    TILE_R = _pick_row_tile(GN)
    n_row_tiles = GN // TILE_R

    # --- operands: bf16 MXU inputs (f32 accumulation happens in-kernel) ---
    if G == 1:
        a_bd = sym_norm_adj
    else:
        a_bd = jnp.kron(jnp.eye(G, dtype=sym_norm_adj.dtype), sym_norm_adj)
    a_bd = a_bd.astype(jnp.bfloat16)
    # kron(I_T, Theta^T): applies Theta per timestep directly on the lane-dense
    # (.., T*F_in) slab, eliminating the cross-tile (N*T,F_out)->(N,T*F_out) relayout.
    w_bd = jnp.kron(jnp.eye(T, dtype=theta_weight_t.dtype),
                    theta_weight_t).astype(jnp.bfloat16)
    # Free reshapes only (adjacent-dim merges, no HBM transpose):
    #   (B, N, T, F_in) -> (n_groups, G*N, T*F_in)
    x_slab = x.reshape(n_groups, GN, TFI).astype(jnp.bfloat16)

    out = pl.pallas_call(
        gcn_ff_kernel,
        out_shape=jax.ShapeDtypeStruct((n_groups, GN, TFO), x.dtype),
        grid=(n_groups, n_row_tiles),
        in_specs=[
            # adjacency row tile: streams along the inner (row-tile) axis
            pl.BlockSpec((TILE_R, GN), lambda g, r: (r, 0)),
            # block-diagonal weight: grid-invariant, fetched once
            pl.BlockSpec((TFI, TFO), lambda g, r: (0, 0)),
            # batch-group slab: constant across the inner row-tile axis (no refetch)
            pl.BlockSpec((None, GN, TFI), lambda g, r: (g, 0, 0)),
        ],
        out_specs=pl.BlockSpec((None, TILE_R, TFO), lambda g, r: (g, r, 0)),
        compiler_params=pltpu.CompilerParams(
            dimension_semantics=("parallel", "parallel"),  # v7x megacore over both axes
            vmem_limit_bytes=32 * 1024 * 1024,             # v5e headroom for bigger tiles
        ),
    )(a_bd, w_bd, x_slab)

    # Free reshape back to the module's output layout.
    return out.reshape(B, N, T, F_out)


def _reference(x, adj, w):
    # pure-JAX f32 reference: relu(A @ x_t @ W) per (b, t); dropout(p=0) is identity.
    y = jnp.einsum("nm,bmtf->bntf", adj, x)
    y = jnp.einsum("bntf,fo->bnto", y, w)
    return jnp.maximum(y, 0.0)


if __name__ == "__main__":
    B, N, T, F_in, F_out = 2, 16, 8, 32, 32

    key = jax.random.PRNGKey(0)
    k_x, k_a, k_w = jax.random.split(key, 3)

    x = jax.random.normal(k_x, (B, N, T, F_in), dtype=jnp.float32)

    # deterministic symmetric-normalized adjacency: A_hat = D^-1/2 (A + I) D^-1/2
    a_rand = (jax.random.uniform(k_a, (N, N)) > 0.7).astype(jnp.float32)
    a_sym = jnp.maximum(a_rand, a_rand.T) + jnp.eye(N, dtype=jnp.float32)
    deg = jnp.sum(a_sym, axis=1)
    d_inv_sqrt = 1.0 / jnp.sqrt(deg)
    sym_norm_adj = a_sym * d_inv_sqrt[:, None] * d_inv_sqrt[None, :]

    # Theta: nn.Linear(F_in, F_out, bias=False); stored as (F_in, F_out) = weight.T
    theta_weight_t = (jax.random.normal(k_w, (F_in, F_out), dtype=jnp.float32)
                      / jnp.sqrt(jnp.float32(F_in)))

    out = position_wise_gcn_feed_forward(x, sym_norm_adj, theta_weight_t)
    out = jax.block_until_ready(out)

    ref = _reference(x, sym_norm_adj, theta_weight_t)
    assert out.shape == (B, N, T, F_out)
    # bf16 MXU inputs -> loosened tolerance vs the pure-f32 reference.
    assert jnp.allclose(out, ref, atol=3e-2, rtol=3e-2), float(jnp.max(jnp.abs(out - ref)))

    print("KERNEL_OK")
</pallas_src>

<mosaic_0001>
module attributes {stable_mosaic.version = 11 : i64} {
  func.func @gcn_ff_kernel(%arg0: i32, %arg1: i32, %arg2: memref<32x32xbf16, #tpu.memory_space<vmem>>, %arg3: memref<256x256xbf16, #tpu.memory_space<vmem>>, %arg4: memref<1x32x256xbf16, #tpu.memory_space<vmem>>, %arg5: memref<1x32x256xf32, #tpu.memory_space<vmem>>) attributes {dimension_semantics = [#tpu.dimension_semantics<parallel>, #tpu.dimension_semantics<parallel>], iteration_bounds = array<i64: 1, 1>, scalar_prefetch = 0 : i64, scratch_operands = 0 : i64, tpu.core_type = #tpu.core_type<tc>, window_params = [{transform_indices = @transform_0, window_bounds = array<i64: 32, 32>}, {pipeline_mode = #tpu.pipeline_mode<synchronous>, transform_indices = @transform_1, window_bounds = array<i64: 256, 256>}, {transform_indices = @transform_2, window_bounds = array<i64: 1, 32, 256>}, {transform_indices = @transform_3, window_bounds = array<i64: 1, 32, 256>}]} {
    %c0 = arith.constant 0 : index
    %c0_0 = arith.constant 0 : index
    %0 = vector.load %arg2[%c0, %c0_0] : memref<32x32xbf16, #tpu.memory_space<vmem>>, vector<32x32xbf16>
    %c0_1 = arith.constant 0 : index
    %c0_2 = arith.constant 0 : index
    %c0_3 = arith.constant 0 : index
    %1 = vector.load %arg4[%c0_1, %c0_2, %c0_3] : memref<1x32x256xbf16, #tpu.memory_space<vmem>>, vector<1x32x256xbf16>
    %2 = vector.shape_cast %1 : vector<1x32x256xbf16> to vector<32x256xbf16>
    %cst = arith.constant dense<0.000000e+00> : vector<32x256xf32>
    %3 = tpu.matmul %0, %2, %cst {dimension_numbers = #tpu.dot_dimension_numbers<[1], [0], [0], [1], [0, 0, 1, 1], [], []>} : vector<32x32xbf16>, vector<32x256xbf16>, vector<32x256xf32> -> vector<32x256xf32>
    %c0_4 = arith.constant 0 : index
    %c0_5 = arith.constant 0 : index
    %4 = vector.load %arg3[%c0_4, %c0_5] : memref<256x256xbf16, #tpu.memory_space<vmem>>, vector<256x256xbf16>
    %cst_6 = arith.constant dense<0.000000e+00> : vector<32x256xf32>
    %5 = tpu.matmul %3, %4, %cst_6 {dimension_numbers = #tpu.dot_dimension_numbers<[1], [0], [0], [1], [0, 0, 1, 1], [], []>} : vector<32x256xf32>, vector<256x256xbf16>, vector<32x256xf32> -> vector<32x256xf32>
    %cst_7 = arith.constant 0.000000e+00 : f32
    %6 = vector.broadcast %cst_7 : f32 to vector<32x256xf32>
    %7 = arith.maximumf %5, %6 : vector<32x256xf32>
    %c0_8 = arith.constant 0 : index
    %c0_9 = arith.constant 0 : index
    %c0_10 = arith.constant 0 : index
    %8 = vector.load %arg5[%c0_8, %c0_9, %c0_10] : memref<1x32x256xf32, #tpu.memory_space<vmem>>, vector<1x32x256xf32>
    %9 = vector.shape_cast %8 : vector<1x32x256xf32> to vector<32x256xf32>
    %10 = vector.shape_cast %7 : vector<32x256xf32> to vector<1x32x256xf32>
    tpu.vector_store %arg5[%c0_8, %c0_9, %c0_10], %10 {strides = array<i32>} : memref<1x32x256xf32, #tpu.memory_space<vmem>>, vector<1x32x256xf32>,
    return
  }
  func.func @transform_0(%arg0: i32, %arg1: i32) -> (i32, i32) {
    %c0_i32 = arith.constant 0 : i32
    %c0_i32_0 = arith.constant 0 : i32
    return %arg1, %c0_i32 : i32, i32
  }
  func.func @transform_1(%arg0: i32, %arg1: i32) -> (i32, i32) {
    %c0_i32 = arith.constant 0 : i32
    %c0_i32_0 = arith.constant 0 : i32
    %c0_i32_1 = arith.constant 0 : i32
    return %c0_i32, %c0_i32_0 : i32, i32
  }
  func.func @transform_2(%arg0: i32, %arg1: i32) -> (i32, i32, i32) {
    %c0_i32 = arith.constant 0 : i32
    %c0_i32_0 = arith.constant 0 : i32
    %c0_i32_1 = arith.constant 0 : i32
    return %arg0, %c0_i32, %c0_i32_0 : i32, i32, i32
  }
  func.func @transform_3(%arg0: i32, %arg1: i32) -> (i32, i32, i32) {
    %c0_i32 = arith.constant 0 : i32
    %c0_i32_0 = arith.constant 0 : i32
    return %arg0, %arg1, %c0_i32 : i32, i32, i32
  }
}

</mosaic_0001>

<bundles_post_ra>
// kernel: tpu_custom_call.1
= control target key start
LH: loop header
LB: loop body
LE: loop exit
PB: predicated region body
PF: predicated region fallthrough
CT: control target
= control target key end

     0   :  { %8 = vsyncpa [#allocation3], 0  ;;  %s758_s0 = inlined_call_operand.hbm [shape: bf16[32,32], index: 0, kind: input, shape index: {}]   ;;  %s759_s1 = inlined_call_operand.hbm [shape: bf16[256,256], index: 1, kind: input, shape index: {}]   ;;  %s760_s2 = inlined_call_operand.hbm [shape: bf16[1,32,256], index: 2, kind: input, shape index: {}]   ;;  %s761_s3 = inlined_call_operand.hbm [shape: f32[1,32,256], index: 3, kind: output, shape index: {}]  }
   0x1   :  { %9 = vsyncpa [#allocation6], 0 }
   0x2   :  { %10 = vsyncpa [#allocation4], 0  ;;  %s671_s12 = smov [#allocation5]   ;;  %s577_s16 = scalar_lea.hbm %s759_s1, 4096 }
   0x3   :  { %s28_s13 = sshll.u32 %s671_s12, 4  ;;  %p578_p0 = scmp.ne.s32.totalorder %s759_s1, %s577_s16  ;;  %s29_s13 = int_to_ptr.vmem [resolvable:$true] %s28_s13 }
   0x4   :  { %p581_p1 = scmp.lt.u32.totalorder %s577_s16, %s759_s1 }
   0x6   :  { %p583_p2 = pnand %p581_p1, %p578_p0 }
   0x8   :  { %586 = shalt.err (!%p583_p2)
}
   0x9   :  { %s587_s21 = scalar_lea.vmem %s29_s13, 4096  ;;  %p592_p4 = scmp.lt.s32.totalorder %s29_s13, %s29_s13 }
   0xa   :  { %p588_p3 = scmp.ne.s32.totalorder %s29_s13, %s587_s21  ;;  %p593_p5 = scmp.lt.s32.totalorder %s587_s21, %s587_s21 }
   0xc   :  { %p594_p6 = por %p593_p5, %p592_p4 }
   0xe   :  { %p595_p7 = pnand %p594_p6, %p588_p3 }
  0x10   :  { %598 = shalt.err (!%p595_p7)
}
  0x11   :  { %s672_s22 = smov 128   ;;  %s673_s23 = smov 8  }
  0x12   :  { %34 = dma.hbm_to_vmem [thread:$0]  %s759_s1, 4096, %s29_s13, [#allocation6], %s672_s22, %s672_s22, %s673_s23  }
  0x13   :  { %s674_s26 = smov [#allocation2]   ;;  %s599_s30 = scalar_lea.hbm %s758_s0, 256 }
  0x14   :  { %s16_s27 = sshll.u32 %s674_s26, 4  ;;  %p600_p8 = scmp.ne.s32.totalorder %s758_s0, %s599_s30  ;;  %s17_s27 = int_to_ptr.vmem [resolvable:$true] %s16_s27 }
  0x15   :  { %p603_p9 = scmp.lt.u32.totalorder %s599_s30, %s758_s0 }
  0x17   :  { %p605_p10 = pnand %p603_p9, %p600_p8 }
  0x19   :  { %608 = shalt.err (!%p605_p10)
}
  0x1a   :  { %s609_s8 = scalar_lea.vmem %s17_s27, 256  ;;  %p614_p12 = scmp.lt.s32.totalorder %s17_s27, %s17_s27 }
  0x1b   :  { %p610_p11 = scmp.ne.s32.totalorder %s17_s27, %s609_s8  ;;  %p615_p13 = scmp.lt.s32.totalorder %s609_s8, %s609_s8 }
  0x1d   :  { %p616_p0 = por %p615_p13, %p614_p12 }
  0x1f   :  { %p617_p1 = pnand %p616_p0, %p610_p11 }
  0x21   :  { %620 = shalt.err (!%p617_p1)
}
  0x22   :  { %s675_s1 = smov 64   ;;  %s676_s9 = smov 4  }
  0x23   :  { %22 = dma.hbm_to_vmem [thread:$0]  %s758_s0, 256, %s17_s27, [#allocation3], %s675_s1, %s675_s1, %s676_s9  }
  0x24   :  { %s677_s12 = smov [#allocation7]   ;;  %s621_s16 = scalar_lea.hbm %s760_s2, 512 }
  0x25   :  { %s40_s13 = sshll.u32 %s677_s12, 4  ;;  %p622_p2 = scmp.ne.s32.totalorder %s760_s2, %s621_s16  ;;  %s41_s13 = int_to_ptr.vmem [resolvable:$true] %s40_s13 }
  0x26   :  { %p625_p3 = scmp.lt.u32.totalorder %s621_s16, %s760_s2 }
  0x28   :  { %p627_p4 = pnand %p625_p3, %p622_p2 }
  0x2a   :  { %630 = shalt.err (!%p627_p4)
}
  0x2b   :  { %s631_s21 = scalar_lea.vmem %s41_s13, 512  ;;  %p636_p6 = scmp.lt.s32.totalorder %s41_s13, %s41_s13 }
  0x2c   :  { %p632_p5 = scmp.ne.s32.totalorder %s41_s13, %s631_s21  ;;  %p637_p7 = scmp.lt.s32.totalorder %s631_s21, %s631_s21 }
  0x2e   :  { %p638_p8 = por %p637_p7, %p636_p6 }
  0x30   :  { %p639_p9 = pnand %p638_p8, %p632_p5 }
  0x32   :  { %642 = shalt.err (!%p639_p9)
}
  0x33   :  { %46 = dma.hbm_to_vmem [thread:$0]  %s760_s2, 512, %s41_s13, [#allocation6], %s672_s22, %s672_s22, %s673_s23  }
  0x34   :  { %665 = dma.done.wait [#allocation3], 256  }
  0x35   :  { %666 = vsyncadd [#allocation3], 4294967040 }
  0x36   :  { %667 = dma.done.wait [#allocation6], 4608  }
  0x37   :  { %668 = vsyncadd [#allocation6], 4294962688  ;;  %v678_v0 = vmov 0   ;;  %v521_v1 = vld [vmem:[#allocation7 + $0x4] ss:$8 sps:$4 sm:$0xff]   ;;  %v527_v5 = vld [vmem:[#allocation2] sm:$0xff]  }
  0x38   :  { %134 = vmatprep.mubr.bf16.mxu0 %v678_v0  ;;  %v523_v2 = vld [vmem:[#allocation7] ss:$8 sps:$4 sm:$0xff]   ;;  %102 = vmatprep.subr.bf16.mxu0 %v521_v1  ;;  %v524_v3 = vld [vmem:[#allocation7 + $0x14] ss:$8 sps:$4 sm:$0xff]   ;;  %v526_v4 = vld [vmem:[#allocation7 + $0x10] ss:$8 sps:$4 sm:$0xff]  }
  0x39   :  { %103 = vmatpush1.bf16.msra.mxu0 %v523_v2  ;;  %v531_v6 = vld [vmem:[#allocation5 + $0x4] ss:$8 sps:$4 sm:$0xff]   ;;  %v529_v7 = vld [vmem:[#allocation5] ss:$8 sps:$4 sm:$0xff]   ;;  %vm95_vm0 = vcmask 261120   ;;  %v528_v11 = vld [vmem:[#allocation2 + $0x8] sm:$0xff]  }
  0x3a   :  { %104 = vmatprep.subr.bf16.mxu0 %v524_v3  ;;  %478 = vmatprep.subr.bf16.mxu1 %v531_v6  ;;  %v534_v8 = vld [vmem:[#allocation5 + $0x14] ss:$8 sps:$4 sm:$0xff]   ;;  %v532_v9 = vld [vmem:[#allocation5 + $0x10] ss:$8 sps:$4 sm:$0xff]   ;;  %v537_v10 = vld [vmem:[#allocation5 + $0x24] ss:$8 sps:$4 sm:$0xff]  }
  0x3b   :  { %494 = vmatpush1.bf16.msra.mxu1 %v529_v7  ;;  %v535_v12 = vld [vmem:[#allocation5 + $0x20] ss:$8 sps:$4 sm:$0xff]   ;;  %v540_v13 = vld [vmem:[#allocation5 + $0x34] ss:$8 sps:$4 sm:$0xff]   ;;  %v538_v14 = vld [vmem:[#allocation5 + $0x30] ss:$8 sps:$4 sm:$0xff]  }
  0x3c   :  { %479 = vmatprep.subr.bf16.mxu1 %v534_v8  ;;  %v543_v15 = vld [vmem:[#allocation5 + $0x44] ss:$8 sps:$4 sm:$0xff]   ;;  %v541_v16 = vld [vmem:[#allocation5 + $0x40] ss:$8 sps:$4 sm:$0xff]   ;;  %v546_v17 = vld [vmem:[#allocation5 + $0x54] ss:$8 sps:$4 sm:$0xff]  }
  0x3d   :  { %105 = vmatpush1.bf16.msra.mxu0 %v526_v4  ;;  %v544_v18 = vld [vmem:[#allocation5 + $0x50] ss:$8 sps:$4 sm:$0xff]   ;;  %v549_v19 = vld [vmem:[#allocation5 + $0x64] ss:$8 sps:$4 sm:$0xff]   ;;  %v547_v20 = vld [vmem:[#allocation5 + $0x60] ss:$8 sps:$4 sm:$0xff]  }
  0x3e   :  { %347 = vmatprep.subr.bf16.mxu0 %v531_v6  ;;  %v552_v21 = vld [vmem:[#allocation5 + $0x74] ss:$8 sps:$4 sm:$0xff]   ;;  %v550_v22 = vld [vmem:[#allocation5 + $0x70] ss:$8 sps:$4 sm:$0xff]   ;;  %v555_v23 = vld [vmem:[#allocation5 + $0x84] ss:$8 sps:$4 sm:$0xff]  }
  0x3f   :  { %495 = vmatpush1.bf16.msra.mxu1 %v532_v9  ;;  %v553_v24 = vld [vmem:[#allocation5 + $0x80] ss:$8 sps:$4 sm:$0xff]   ;;  %v558_v25 = vld [vmem:[#allocation5 + $0x94] ss:$8 sps:$4 sm:$0xff]   ;;  %v556_v26 = vld [vmem:[#allocation5 + $0x90] ss:$8 sps:$4 sm:$0xff]  }
  0x40   :  { %444 = vmatmul.mubr.msk.bf16.vlgmr.msra.gmra.mrb[0].mxu0 %vm95_vm0, %v527_v5  ;;  %480 = vmatprep.subr.bf16.mxu1 %v537_v10  ;;  %v561_v27 = vld [vmem:[#allocation5 + $0xa4] ss:$8 sps:$4 sm:$0xff]   ;;  %v559_v28 = vld [vmem:[#allocation5 + $0xa0] ss:$8 sps:$4 sm:$0xff]   ;;  %v564_v29 = vld [vmem:[#allocation5 + $0xb4] ss:$8 sps:$4 sm:$0xff]  }
  0x41   :  { %144 = vmatprep.mubr.bf16.mxu0 %v678_v0  ;;  %348 = vmatpush1.bf16.msra.mxu0 %v529_v7  ;;  %v562_v30 = vld [vmem:[#allocation5 + $0xb0] ss:$8 sps:$4 sm:$0xff]   ;;  %v567_v31 = vld [vmem:[#allocation5 + $0xc4] ss:$8 sps:$4 sm:$0xff]   ;;  %v565_v32 = vld [vmem:[#allocation5 + $0xc0] ss:$8 sps:$4 sm:$0xff]  }
  0x42   :  { %349 = vmatprep.subr.bf16.mxu0 %v534_v8  ;;  %v570_v33 = vld [vmem:[#allocation5 + $0xd4] ss:$8 sps:$4 sm:$0xff]   ;;  %v568_v34 = vld [vmem:[#allocation5 + $0xd0] ss:$8 sps:$4 sm:$0xff]   ;;  %v573_v35 = vld [vmem:[#allocation5 + $0xe4] ss:$8 sps:$4 sm:$0xff]  }
  0x43   :  { %496 = vmatpush1.bf16.msra.mxu1 %v535_v12  ;;  %v571_v36 = vld [vmem:[#allocation5 + $0xe0] ss:$8 sps:$4 sm:$0xff]   ;;  %v576_v37 = vld [vmem:[#allocation5 + $0xf4] ss:$8 sps:$4 sm:$0xff]   ;;  %v574_v38 = vld [vmem:[#allocation5 + $0xf0] ss:$8 sps:$4 sm:$0xff]  }
  0x44   :  { %481 = vmatprep.subr.bf16.mxu1 %v540_v13  ;;  %s679_s2 = smov [#allocation8]  }
  0x45   :  { %350 = vmatpush1.bf16.msra.mxu0 %v532_v9  ;;  %s425_s22 = sshll.u32 %s679_s2, 4  ;;  %s426_s22 = int_to_ptr.vmem [resolvable:$true] %s425_s22 }
  0x46   :  { %351 = vmatprep.subr.bf16.mxu0 %v537_v10  ;;  %s643_s23 = scalar_lea.vmem %s426_s22, 1024  ;;  %p648_p11 = scmp.lt.s32.totalorder %s426_s22, %s426_s22 }
  0x47   :  { %497 = vmatpush1.bf16.msra.mxu1 %v538_v14  ;;  %p644_p10 = scmp.ne.s32.totalorder %s426_s22, %s643_s23  ;;  %p649_p12 = scmp.lt.s32.totalorder %s643_s23, %s643_s23 }
  0x48   :  { %445 = vmatmul.mubr.msk.bf16.gmra.mrb[4].mxu0 %vm95_vm0, %v528_v11  ;;  %482 = vmatprep.subr.bf16.mxu1 %v543_v15 }
  0x49   :  { %352 = vmatpush1.bf16.msra.mxu0 %v535_v12  ;;  %p650_p13 = por %p649_p12, %p648_p11 }
  0x4a   :  { %353 = vmatprep.subr.bf16.mxu0 %v540_v13 }
  0x4b   :  { %498 = vmatpush1.bf16.msra.mxu1 %v541_v16  ;;  %p651_p0 = pnand %p650_p13, %p644_p10 }
  0x4c   :  { %483 = vmatprep.subr.bf16.mxu1 %v546_v17 }
  0x4d   :  { %354 = vmatpush1.bf16.msra.mxu0 %v538_v14 }
  0x4e   :  { %355 = vmatprep.subr.bf16.mxu0 %v543_v15 }
  0x4f   :  { %499 = vmatpush1.bf16.msra.mxu1 %v544_v18 }
  0x50   :  { %484 = vmatprep.subr.bf16.mxu1 %v549_v19 }
  0x51   :  { %356 = vmatpush1.bf16.msra.mxu0 %v541_v16 }
  0x52   :  { %357 = vmatprep.subr.bf16.mxu0 %v546_v17 }
  0x53   :  { %500 = vmatpush1.bf16.msra.mxu1 %v547_v20 }
  0x54   :  { %485 = vmatprep.subr.bf16.mxu1 %v552_v21 }
  0x55   :  { %358 = vmatpush1.bf16.msra.mxu0 %v544_v18 }
  0x56   :  { %359 = vmatprep.subr.bf16.mxu0 %v549_v19 }
  0x57   :  { %501 = vmatpush1.bf16.msra.mxu1 %v550_v22 }
  0x58   :  { %486 = vmatprep.subr.bf16.mxu1 %v555_v23 }
  0x59   :  { %360 = vmatpush1.bf16.msra.mxu0 %v547_v20 }
  0x5a   :  { %361 = vmatprep.subr.bf16.mxu0 %v552_v21 }
  0x5b   :  { %502 = vmatpush1.bf16.msra.mxu1 %v553_v24 }
  0x5c   :  { %487 = vmatprep.subr.bf16.mxu1 %v558_v25 }
  0x5d   :  { %362 = vmatpush1.bf16.msra.mxu0 %v550_v22 }
  0x5e   :  { %363 = vmatprep.subr.bf16.mxu0 %v555_v23 }
  0x5f   :  { %503 = vmatpush1.bf16.msra.mxu1 %v556_v26 }
  0x60   :  { %488 = vmatprep.subr.bf16.mxu1 %v561_v27 }
  0x61   :  { %364 = vmatpush1.bf16.msra.mxu0 %v553_v24 }
  0x62   :  { %365 = vmatprep.subr.bf16.mxu0 %v558_v25 }
  0x63   :  { %504 = vmatpush1.bf16.msra.mxu1 %v559_v28 }
  0x64   :  { %489 = vmatprep.subr.bf16.mxu1 %v564_v29 }
  0x65   :  { %366 = vmatpush1.bf16.msra.mxu0 %v556_v26 }
  0x66   :  { %367 = vmatprep.subr.bf16.mxu0 %v561_v27 }
  0x67   :  { %505 = vmatpush1.bf16.msra.mxu1 %v562_v30 }
  0x68   :  { %490 = vmatprep.subr.bf16.mxu1 %v567_v31 }
  0x69   :  { %368 = vmatpush1.bf16.msra.mxu0 %v559_v28 }
  0x6a   :  { %369 = vmatprep.subr.bf16.mxu0 %v564_v29 }
  0x6b   :  { %506 = vmatpush1.bf16.msra.mxu1 %v565_v32 }
  0x6c   :  { %491 = vmatprep.subr.bf16.mxu1 %v570_v33 }
  0x6d   :  { %370 = vmatpush1.bf16.msra.mxu0 %v562_v30 }
  0x6e   :  { %371 = vmatprep.subr.bf16.mxu0 %v567_v31 }
  0x6f   :  { %507 = vmatpush1.bf16.msra.mxu1 %v568_v34 }
  0x70   :  { %492 = vmatprep.subr.bf16.mxu1 %v573_v35 }
  0x71   :  { %372 = vmatpush1.bf16.msra.mxu0 %v565_v32 }
  0x72   :  { %373 = vmatprep.subr.bf16.mxu0 %v570_v33 }
  0x73   :  { %508 = vmatpush1.bf16.msra.mxu1 %v571_v36 }
  0x74   :  { %493 = vmatprep.subr.bf16.mxu1 %v576_v37 }
  0x75   :  { %374 = vmatpush1.bf16.msra.mxu0 %v568_v34 }
  0x76   :  { %375 = vmatprep.subr.bf16.mxu0 %v573_v35 }
  0x77   :  { %509 = vmatpush1.bf16.msra.mxu1 %v574_v38 }
  0x79   :  { %376 = vmatpush1.bf16.msra.mxu0 %v571_v36 }
  0x7a   :  { %377 = vmatprep.subr.bf16.mxu0 %v576_v37 }
  0x7d   :  { %378 = vmatpush1.bf16.msra.mxu0 %v574_v38 }
 0x113   :  { %v136_v39 = vpop.f32.mrb[0].mxu0 }
 0x114   :  { %v138_v40 = vpop.f32.mrb[1].mxu0 }
 0x115   :  { %v140_v41 = vpop.f32.mrb[2].mxu0  ;;  %379 = vmatprep.mubr.f32.mxu0 %v138_v40 }
 0x116   :  { %v142_v42 = vpop.f32.mrb[3].mxu0  ;;  %380 = vmatmul.mubr.f32.vlgmr.msra.gmra.mrb[8].mxu0 %v136_v39 }
 0x117   :  { %385 = vmatprep.mubr.f32.mxu1 %v142_v42 }
 0x118   :  { %386 = vmatmul.mubr.f32.vlgmr.msra.gmra.mrb[0].mxu1 %v140_v41 }
 0x11b   :  { %v146_v43 = vpop.f32.mrb[4].mxu0 }
 0x11c   :  { %v148_v44 = vpop.f32.mrb[5].mxu0 }
 0x11d   :  { %v150_v45 = vpop.f32.mrb[6].mxu0  ;;  %391 = vmatprep.mubr.f32.mxu1 %v148_v44 }
 0x11e   :  { %v152_v46 = vpop.f32.mrb[7].mxu0  ;;  %392 = vmatmul.mubr.f32.gmra.mrb[2].mxu1 %v146_v43 }
 0x11f   :  { %397 = vmatprep.mubr.f32.mxu1 %v152_v46 }
 0x122   :  { %398 = vmatmul.mubr.f32.gmra.mrb[4].mxu1 %v150_v45 }
 0x1e9   :  { %v381_v47 = vpop.f32.mrb[8].mxu0 }
 0x1ea   :  { %v404_v48 = vmax.f32 %v381_v47, 0.0  ;;  %v383_v49 = vpop.f32.mrb[9].mxu0 }
 0x1eb   :  { %v405_v50 = vmax.f32 %v383_v49, 0.0  ;;  %v387_v51 = vpop.f32.mrb[0].mxu1 }
 0x1ec   :  { %412 = vst [vmem:[#allocation8] sm:$0xff] %v404_v48  ;;  %v406_v52 = vmax.f32 %v387_v51, 0.0  ;;  %v389_v53 = vpop.f32.mrb[1].mxu1 }
 0x1ed   :  { %413 = vst [vmem:[#allocation8 + $0x8] sm:$0xff] %v405_v50  ;;  %v407_v54 = vmax.f32 %v389_v53, 0.0 }
 0x1ee   :  { %414 = vst [vmem:[#allocation8 + $0x10] sm:$0xff] %v406_v52 }
 0x1ef   :  { %415 = vst [vmem:[#allocation8 + $0x18] sm:$0xff] %v407_v54 }
 0x1f1   :  { %v393_v55 = vpop.f32.mrb[2].mxu1 }
 0x1f2   :  { %v408_v56 = vmax.f32 %v393_v55, 0.0  ;;  %v395_v57 = vpop.f32.mrb[3].mxu1 }
 0x1f3   :  { %v409_v58 = vmax.f32 %v395_v57, 0.0 }
 0x1f4   :  { %416 = vst [vmem:[#allocation8 + $0x20] sm:$0xff] %v408_v56 }
 0x1f5   :  { %417 = vst [vmem:[#allocation8 + $0x28] sm:$0xff] %v409_v58  ;;  %v399_v59 = vpop.f32.mrb[4].mxu1 }
 0x1f6   :  { %v410_v60 = vmax.f32 %v399_v59, 0.0  ;;  %v401_v61 = vpop.f32.mrb[5].mxu1 }
 0x1f7   :  { %v411_v62 = vmax.f32 %v401_v61, 0.0 }
 0x1f8   :  { %418 = vst [vmem:[#allocation8 + $0x30] sm:$0xff] %v410_v60 }
 0x1f9   :  { %419 = vst [vmem:[#allocation8 + $0x38] sm:$0xff] %v411_v62 }
 0x1fa   :  { %654 = shalt.err (!%p651_p0)
}
 0x1fb   :  { %s655_s27 = scalar_lea.hbm %s761_s3, 1024 }
 0x1fc   :  { %p656_p1 = scmp.ne.s32.totalorder %s761_s3, %s655_s27  ;;  %p659_p2 = scmp.lt.u32.totalorder %s655_s27, %s761_s3 }
 0x1fe   :  { %p661_p3 = pnand %p659_p2, %p656_p1 }
 0x200   :  { %664 = shalt.err (!%p661_p3)
}
 0x201   :  { %s680_s5 = smov 256   ;;  %s681_s6 = smov 16  }
 0x202   :  { %431 = dma.vmem_to_hbm [thread:$0]  %s426_s22, 1024, %s761_s3, [#allocation4], %s680_s5, %s680_s5, %s681_s6  }
 0x203   :  { %669 = dma.done.wait [#allocation4], 1024  }
 0x204   :  { %670 = vsyncadd [#allocation4], 4294966272 }
 0x205   :  { %435 = vsyncpa [#allocation3], 1 }
 0x206   :  { %436 = vsyncpa [#allocation6], 1 }
 0x207   :  { %437 = vsyncpa [#allocation4], 1 }

</bundles_post_ra>
